<compile_context>
chip_gen: v6e
topology: v6e:2x2x1
jax: 0.10.0
libtpu: 0.0.40
codegen_flags: <defaults>
</compile_context>

<pallas_src>
import jax
import jax.numpy as jnp
from jax.experimental import pallas as pl
from jax.experimental.pallas import tpu as pltpu


def _make_fused_cosine_kernel(block_dims):
    """block_dims: tuple of (K_i, S_i). Returns a kernel computing every block from one x tile."""
    n_blocks = len(block_dims)

    def kernel(x_ref, *refs):
        shp_refs = refs[:n_blocks]
        out_refs = refs[n_blocks:]
        TB, C, L = x_ref.shape

        x = x_ref[...]                                            # (TB, C, L) f32, loaded once

        for (K, S), shp_ref, out_ref in zip(block_dims, shp_refs, out_refs):
            W = L - S + 1

            # Unfold: S whole-tile lane slices (vectorized over TB and C).
            slices = [x[:, :, s:s + W] for s in range(S)]         # each (TB, C, W)

            # Per-(batch, channel, window) squared norm, accumulated elementwise.
            ssq = slices[0] * slices[0]
            for s in range(1, S):
                ssq = ssq + slices[s] * slices[s]
            # 1 / max(||window||, 1e-8) == rsqrt(max(||window||^2, 1e-16)); rsqrt -> EUP.
            inv = jax.lax.rsqrt(jnp.maximum(ssq, 1e-16))          # (TB, C, W)

            # Normalized, channel-fused unfold: xn[b, s*C + c, w] = x[b, c, w+s] / ||win(b,c,w)||.
            xn = jnp.concatenate([sl * inv for sl in slices], axis=1)   # (TB, S*C, W)

            # Pre-normalized shapelets with the 1/C channel mean folded in (hoisted to wrapper).
            shp_b = jnp.broadcast_to(shp_ref[...][None, :, :], (TB, K, S * C))
            sim = jnp.einsum('bkd,bdw->bkw', shp_b, xn,
                             preferred_element_type=jnp.float32)  # (TB, K, W)

            # ReLU commutes with the max over W (and with the positive 1/C scale).
            out_ref[...] = jnp.maximum(jnp.max(sim, axis=2), 0.0)  # (TB, K)

    return kernel


def shapelets_dist_blocks_cosine(x, shapelets_per_block, *, batch_tile=128):
    """ShapeletsDistBlocks forward for dist_measure='cosine'.

    x: (N, C, L) float array.
    shapelets_per_block: list of (C, K_i, S_i) parameters, already sorted by shapelet size
      (ShapeletsDistBlocks sorts its OrderedDict by size). Outputs are concatenated on dim 2.
    Returns (N, 1, sum_i K_i) float32.
    """
    N, C, L = x.shape

    block_dims = []
    shp_mats = []
    for shp in shapelets_per_block:
        Cs, K, S = shp.shape
        assert Cs == C, (Cs, C)
        assert L >= S, (L, S)
        # Hoisted one-time shapelet prep (constant across the whole grid):
        #   L2-normalize along S (clamp 1e-8), fold in the 1/C channel mean, and reorder so the
        #   contraction index is s*C + c to match the in-kernel unfold layout.
        sn = shp / jnp.maximum(jnp.linalg.norm(shp, axis=-1, keepdims=True), 1e-8)   # (C, K, S)
        shp_mats.append(
            (jnp.transpose(sn, (1, 2, 0)).reshape(K, S * C) / C).astype(jnp.float32))  # (K, D)
        block_dims.append((K, S))
    block_dims = tuple(block_dims)

    # Batch tiling: TB batch elements per grid step (all of N for small N). Kept modest so the
    # double-buffered x tiles + per-block intermediates stay small even on v7x's 64 MiB VMEM.
    TB = int(min(N, batch_tile))
    n_tiles = -(-N // TB)
    N_pad = n_tiles * TB
    xf = x.astype(jnp.float32)
    if N_pad != N:
        # Zero padding is safe: zero windows -> clamped norm -> sim 0 -> relu 0; rows sliced off.
        xf = jnp.pad(xf, ((0, N_pad - N), (0, 0), (0, 0)))

    in_specs = [pl.BlockSpec((TB, C, L), lambda b: (b, 0, 0))]
    in_specs += [pl.BlockSpec((K, S * C), lambda b: (0, 0)) for (K, S) in block_dims]
    out_shape = tuple(jax.ShapeDtypeStruct((N_pad, K), jnp.float32) for (K, _) in block_dims)
    out_specs = [pl.BlockSpec((TB, K), lambda b: (b, 0)) for (K, _) in block_dims]

    outs = pl.pallas_call(
        _make_fused_cosine_kernel(block_dims),
        out_shape=out_shape,
        grid=(n_tiles,),
        in_specs=in_specs,
        out_specs=out_specs,
        compiler_params=pltpu.CompilerParams(
            dimension_semantics=("parallel",),
            vmem_limit_bytes=48 * 1024 * 1024),
    )(xf, *shp_mats)

    if not isinstance(outs, (tuple, list)):
        outs = (outs,)
    out = jnp.concatenate([o[:N] for o in outs], axis=1)          # (N, K_total)
    return out.reshape(N, 1, -1)


def _reference_block(x, shapelets):
    # Pure-JAX reference mirroring the PyTorch MaxCosineSimilarityBlock forward exactly.
    N, C, L = x.shape
    _, K, S = shapelets.shape
    W = L - S + 1
    idx = jnp.arange(W)[:, None] + jnp.arange(S)[None, :]
    xu = x[:, :, idx]                                                   # (N, C, W, S)
    xn = xu / jnp.maximum(jnp.linalg.norm(xu, axis=-1, keepdims=True), 1e-8)
    sn = shapelets / jnp.maximum(
        jnp.linalg.norm(shapelets, axis=-1, keepdims=True), 1e-8)       # (C, K, S)
    sim = jnp.einsum('ncws,cks->ncwk', xn, sn)                          # (N, C, W, K)
    out = jnp.sum(sim, axis=1, keepdims=True) / C                       # (N, 1, W, K)
    out = jnp.maximum(jnp.swapaxes(out, 2, 3), 0.0)                     # (N, 1, K, W)
    return jnp.max(out, axis=3)                                         # (N, 1, K)


def _reference(x, shapelets_per_block):
    return jnp.concatenate([_reference_block(x, s) for s in shapelets_per_block], axis=2)


if __name__ == "__main__":
    # Small shapes consistent with the module: batch=2, in_channels=3, seq_len=32,
    # two cosine blocks with shapelet sizes {5: 8, 8: 16} (sorted by size, as the module does).
    N, C, L = 2, 3, 32
    shapelets_size_and_len = {5: 8, 8: 16}

    key = jax.random.PRNGKey(0)
    key, kx = jax.random.split(key)
    x = jax.random.normal(kx, (N, C, L), dtype=jnp.float32)

    blocks = []
    for size in sorted(shapelets_size_and_len):
        key, kw = jax.random.split(key)
        num = shapelets_size_and_len[size]
        # Deterministic "randn" parameter, shape (in_channels, num_shapelets, shapelets_size).
        blocks.append(jax.random.normal(kw, (C, num, size), dtype=jnp.float32))

    out = shapelets_dist_blocks_cosine(x, blocks)
    out = jax.block_until_ready(out)

    ref = _reference(x, blocks)
    total_k = sum(shapelets_size_and_len.values())
    assert out.shape == (N, 1, total_k), out.shape
    assert jnp.allclose(out, ref, atol=1e-5, rtol=1e-5), (
        float(jnp.max(jnp.abs(out - ref))))

    print("KERNEL_OK")
</pallas_src>

<mosaic_0001>
module attributes {stable_mosaic.version = 11 : i64} {
  func.func @kernel(%arg0: i32, %arg1: memref<2x3x32xf32, #tpu.memory_space<vmem>>, %arg2: memref<8x15xf32, #tpu.memory_space<vmem>>, %arg3: memref<16x24xf32, #tpu.memory_space<vmem>>, %arg4: memref<2x8xf32, #tpu.memory_space<vmem>>, %arg5: memref<2x16xf32, #tpu.memory_space<vmem>>) attributes {dimension_semantics = [#tpu.dimension_semantics<parallel>], iteration_bounds = array<i64: 1>, scalar_prefetch = 0 : i64, scratch_operands = 0 : i64, tpu.core_type = #tpu.core_type<tc>, window_params = [{transform_indices = @transform_0, window_bounds = array<i64: 2, 3, 32>}, {pipeline_mode = #tpu.pipeline_mode<synchronous>, transform_indices = @transform_1, window_bounds = array<i64: 8, 15>}, {pipeline_mode = #tpu.pipeline_mode<synchronous>, transform_indices = @transform_2, window_bounds = array<i64: 16, 24>}, {transform_indices = @transform_3, window_bounds = array<i64: 2, 8>}, {transform_indices = @transform_4, window_bounds = array<i64: 2, 16>}]} {
    %c0 = arith.constant 0 : index
    %c0_0 = arith.constant 0 : index
    %c0_1 = arith.constant 0 : index
    %0 = vector.load %arg1[%c0, %c0_0, %c0_1] : memref<2x3x32xf32, #tpu.memory_space<vmem>>, vector<2x3x32xf32>
    %1 = vector.extract_strided_slice %0 {offsets = [0, 0, 0], sizes = [2, 3, 28], strides = [1, 1, 1]} : vector<2x3x32xf32> to vector<2x3x28xf32>
    %2 = vector.extract_strided_slice %0 {offsets = [0, 0, 1], sizes = [2, 3, 28], strides = [1, 1, 1]} : vector<2x3x32xf32> to vector<2x3x28xf32>
    %3 = vector.extract_strided_slice %0 {offsets = [0, 0, 2], sizes = [2, 3, 28], strides = [1, 1, 1]} : vector<2x3x32xf32> to vector<2x3x28xf32>
    %4 = vector.extract_strided_slice %0 {offsets = [0, 0, 3], sizes = [2, 3, 28], strides = [1, 1, 1]} : vector<2x3x32xf32> to vector<2x3x28xf32>
    %5 = vector.extract_strided_slice %0 {offsets = [0, 0, 4], sizes = [2, 3, 28], strides = [1, 1, 1]} : vector<2x3x32xf32> to vector<2x3x28xf32>
    %6 = arith.mulf %1, %1 : vector<2x3x28xf32>
    %7 = arith.mulf %2, %2 : vector<2x3x28xf32>
    %8 = arith.addf %6, %7 : vector<2x3x28xf32>
    %9 = arith.mulf %3, %3 : vector<2x3x28xf32>
    %10 = arith.addf %8, %9 : vector<2x3x28xf32>
    %11 = arith.mulf %4, %4 : vector<2x3x28xf32>
    %12 = arith.addf %10, %11 : vector<2x3x28xf32>
    %13 = arith.mulf %5, %5 : vector<2x3x28xf32>
    %14 = arith.addf %12, %13 : vector<2x3x28xf32>
    %cst = arith.constant 1.000000e-16 : f32
    %15 = vector.broadcast %cst : f32 to vector<2x3x28xf32>
    %16 = arith.maximumf %14, %15 : vector<2x3x28xf32>
    %17 = math.rsqrt %16 : vector<2x3x28xf32>
    %18 = arith.mulf %1, %17 : vector<2x3x28xf32>
    %19 = arith.mulf %2, %17 : vector<2x3x28xf32>
    %20 = arith.mulf %3, %17 : vector<2x3x28xf32>
    %21 = arith.mulf %4, %17 : vector<2x3x28xf32>
    %22 = arith.mulf %5, %17 : vector<2x3x28xf32>
    %23 = tpu.concatenate %18, %19, %20, %21, %22 in 1 : vector<2x3x28xf32>, vector<2x3x28xf32>, vector<2x3x28xf32>, vector<2x3x28xf32>, vector<2x3x28xf32> -> vector<2x15x28xf32>
    %c0_2 = arith.constant 0 : index
    %c0_3 = arith.constant 0 : index
    %24 = vector.load %arg2[%c0_2, %c0_3] : memref<8x15xf32, #tpu.memory_space<vmem>>, vector<8x15xf32>
    %25 = vector.shape_cast %24 : vector<8x15xf32> to vector<1x8x15xf32>
    %26 = vector.shape_cast %25 : vector<1x8x15xf32> to vector<1x8x15xf32>
    %27 = vector.broadcast %26 : vector<1x8x15xf32> to vector<2x8x15xf32>
    "tpu.trace_start"() <{level = 10 : i32, message = "bkd,bdw->bkw"}> : () -> ()
    %cst_4 = arith.constant dense<0.000000e+00> : vector<2x8x28xf32>
    %28 = tpu.matmul %27, %23, %cst_4 {dimension_numbers = #tpu.dot_dimension_numbers<[2], [1], [1], [2], [0, 0, 0, 1, 1, 2], [0], [0]>} : vector<2x8x15xf32>, vector<2x15x28xf32>, vector<2x8x28xf32> -> vector<2x8x28xf32>
    "tpu.trace_stop"() : () -> ()
    %cst_5 = arith.constant dense<0xFF800000> : vector<2x8xf32>
    %29 = vector.multi_reduction <maximumf>, %28, %cst_5 [2] : vector<2x8x28xf32> to vector<2x8xf32>
    %cst_6 = arith.constant 0.000000e+00 : f32
    %30 = vector.broadcast %cst_6 : f32 to vector<2x8xf32>
    %31 = arith.maximumf %29, %30 : vector<2x8xf32>
    %c0_7 = arith.constant 0 : index
    %c0_8 = arith.constant 0 : index
    %32 = vector.load %arg4[%c0_7, %c0_8] : memref<2x8xf32, #tpu.memory_space<vmem>>, vector<2x8xf32>
    tpu.vector_store %arg4[%c0_7, %c0_8], %31 {strides = array<i32>} : memref<2x8xf32, #tpu.memory_space<vmem>>, vector<2x8xf32>,
    %33 = vector.extract_strided_slice %0 {offsets = [0, 0, 0], sizes = [2, 3, 25], strides = [1, 1, 1]} : vector<2x3x32xf32> to vector<2x3x25xf32>
    %34 = vector.extract_strided_slice %0 {offsets = [0, 0, 1], sizes = [2, 3, 25], strides = [1, 1, 1]} : vector<2x3x32xf32> to vector<2x3x25xf32>
    %35 = vector.extract_strided_slice %0 {offsets = [0, 0, 2], sizes = [2, 3, 25], strides = [1, 1, 1]} : vector<2x3x32xf32> to vector<2x3x25xf32>
    %36 = vector.extract_strided_slice %0 {offsets = [0, 0, 3], sizes = [2, 3, 25], strides = [1, 1, 1]} : vector<2x3x32xf32> to vector<2x3x25xf32>
    %37 = vector.extract_strided_slice %0 {offsets = [0, 0, 4], sizes = [2, 3, 25], strides = [1, 1, 1]} : vector<2x3x32xf32> to vector<2x3x25xf32>
    %38 = vector.extract_strided_slice %0 {offsets = [0, 0, 5], sizes = [2, 3, 25], strides = [1, 1, 1]} : vector<2x3x32xf32> to vector<2x3x25xf32>
    %39 = vector.extract_strided_slice %0 {offsets = [0, 0, 6], sizes = [2, 3, 25], strides = [1, 1, 1]} : vector<2x3x32xf32> to vector<2x3x25xf32>
    %40 = vector.extract_strided_slice %0 {offsets = [0, 0, 7], sizes = [2, 3, 25], strides = [1, 1, 1]} : vector<2x3x32xf32> to vector<2x3x25xf32>
    %41 = arith.mulf %33, %33 : vector<2x3x25xf32>
    %42 = arith.mulf %34, %34 : vector<2x3x25xf32>
    %43 = arith.addf %41, %42 : vector<2x3x25xf32>
    %44 = arith.mulf %35, %35 : vector<2x3x25xf32>
    %45 = arith.addf %43, %44 : vector<2x3x25xf32>
    %46 = arith.mulf %36, %36 : vector<2x3x25xf32>
    %47 = arith.addf %45, %46 : vector<2x3x25xf32>
    %48 = arith.mulf %37, %37 : vector<2x3x25xf32>
    %49 = arith.addf %47, %48 : vector<2x3x25xf32>
    %50 = arith.mulf %38, %38 : vector<2x3x25xf32>
    %51 = arith.addf %49, %50 : vector<2x3x25xf32>
    %52 = arith.mulf %39, %39 : vector<2x3x25xf32>
    %53 = arith.addf %51, %52 : vector<2x3x25xf32>
    %54 = arith.mulf %40, %40 : vector<2x3x25xf32>
    %55 = arith.addf %53, %54 : vector<2x3x25xf32>
    %cst_9 = arith.constant 1.000000e-16 : f32
    %56 = vector.broadcast %cst_9 : f32 to vector<2x3x25xf32>
    %57 = arith.maximumf %55, %56 : vector<2x3x25xf32>
    %58 = math.rsqrt %57 : vector<2x3x25xf32>
    %59 = arith.mulf %33, %58 : vector<2x3x25xf32>
    %60 = arith.mulf %34, %58 : vector<2x3x25xf32>
    %61 = arith.mulf %35, %58 : vector<2x3x25xf32>
    %62 = arith.mulf %36, %58 : vector<2x3x25xf32>
    %63 = arith.mulf %37, %58 : vector<2x3x25xf32>
    %64 = arith.mulf %38, %58 : vector<2x3x25xf32>
    %65 = arith.mulf %39, %58 : vector<2x3x25xf32>
    %66 = arith.mulf %40, %58 : vector<2x3x25xf32>
    %67 = tpu.concatenate %59, %60, %61, %62, %63, %64, %65, %66 in 1 : vector<2x3x25xf32>, vector<2x3x25xf32>, vector<2x3x25xf32>, vector<2x3x25xf32>, vector<2x3x25xf32>, vector<2x3x25xf32>, vector<2x3x25xf32>, vector<2x3x25xf32> -> vector<2x24x25xf32>
    %c0_10 = arith.constant 0 : index
    %c0_11 = arith.constant 0 : index
    %68 = vector.load %arg3[%c0_10, %c0_11] : memref<16x24xf32, #tpu.memory_space<vmem>>, vector<16x24xf32>
    %69 = vector.shape_cast %68 : vector<16x24xf32> to vector<1x16x24xf32>
    %70 = vector.shape_cast %69 : vector<1x16x24xf32> to vector<1x16x24xf32>
    %71 = vector.broadcast %70 : vector<1x16x24xf32> to vector<2x16x24xf32>
    "tpu.trace_start"() <{level = 10 : i32, message = "bkd,bdw->bkw"}> : () -> ()
    %cst_12 = arith.constant dense<0.000000e+00> : vector<2x16x25xf32>
    %72 = tpu.matmul %71, %67, %cst_12 {dimension_numbers = #tpu.dot_dimension_numbers<[2], [1], [1], [2], [0, 0, 0, 1, 1, 2], [0], [0]>} : vector<2x16x24xf32>, vector<2x24x25xf32>, vector<2x16x25xf32> -> vector<2x16x25xf32>
    "tpu.trace_stop"() : () -> ()
    %cst_13 = arith.constant dense<0xFF800000> : vector<2x16xf32>
    %73 = vector.multi_reduction <maximumf>, %72, %cst_13 [2] : vector<2x16x25xf32> to vector<2x16xf32>
    %cst_14 = arith.constant 0.000000e+00 : f32
    %74 = vector.broadcast %cst_14 : f32 to vector<2x16xf32>
    %75 = arith.maximumf %73, %74 : vector<2x16xf32>
    %c0_15 = arith.constant 0 : index
    %c0_16 = arith.constant 0 : index
    %76 = vector.load %arg5[%c0_15, %c0_16] : memref<2x16xf32, #tpu.memory_space<vmem>>, vector<2x16xf32>
    tpu.vector_store %arg5[%c0_15, %c0_16], %75 {strides = array<i32>} : memref<2x16xf32, #tpu.memory_space<vmem>>, vector<2x16xf32>,
    return
  }
  func.func @transform_0(%arg0: i32) -> (i32, i32, i32) {
    %c0_i32 = arith.constant 0 : i32
    %c0_i32_0 = arith.constant 0 : i32
    %c0_i32_1 = arith.constant 0 : i32
    return %arg0, %c0_i32, %c0_i32_0 : i32, i32, i32
  }
  func.func @transform_1(%arg0: i32) -> (i32, i32) {
    %c0_i32 = arith.constant 0 : i32
    %c0_i32_0 = arith.constant 0 : i32
    %c0_i32_1 = arith.constant 0 : i32
    return %c0_i32, %c0_i32_0 : i32, i32
  }
  func.func @transform_2(%arg0: i32) -> (i32, i32) {
    %c0_i32 = arith.constant 0 : i32
    %c0_i32_0 = arith.constant 0 : i32
    %c0_i32_1 = arith.constant 0 : i32
    return %c0_i32, %c0_i32_0 : i32, i32
  }
  func.func @transform_3(%arg0: i32) -> (i32, i32) {
    %c0_i32 = arith.constant 0 : i32
    %c0_i32_0 = arith.constant 0 : i32
    return %arg0, %c0_i32 : i32, i32
  }
  func.func @transform_4(%arg0: i32) -> (i32, i32) {
    %c0_i32 = arith.constant 0 : i32
    %c0_i32_0 = arith.constant 0 : i32
    return %arg0, %c0_i32 : i32, i32
  }
}

</mosaic_0001>

<bundles_post_ra>
// kernel: tpu_custom_call.1
= control target key start
LH: loop header
LB: loop body
LE: loop exit
PB: predicated region body
PF: predicated region fallthrough
CT: control target
= control target key end

     0   :  { %10 = vsyncpa [#allocation3], 0  ;;  %s1095_s0 = inlined_call_operand.vmem [shape: f32[2,3,32], index: 0, kind: input, shape index: {}]   ;;  %s1096_s1 = inlined_call_operand.hbm [shape: f32[8,15], index: 1, kind: input, shape index: {}]   ;;  %s1097_s2 = inlined_call_operand.vmem [shape: f32[16,24], index: 2, kind: input, shape index: {}]   ;;  %s1098_s3 = inlined_call_operand.hbm [shape: f32[2,8], index: 3, kind: output, shape index: {0}]   ;;  %s1099_s4 = inlined_call_operand.hbm [shape: f32[2,16], index: 4, kind: output, shape index: {1}]  }
   0x1   :  { %11 = vsyncpa [#allocation4], 0 }
   0x2   :  { %12 = vsyncpa [#allocation7], 0  ;;  %s894_s15 = smov [#allocation2]  }
   0x3   :  { %s21_s16 = sshll.u32 %s894_s15, 4  ;;  %s22_s16 = int_to_ptr.vmem [resolvable:$true] %s21_s16 }
   0x4   :  { %s836_s17 = scalar_lea.vmem %s22_s16, 128  ;;  %p841_p1 = scmp.lt.s32.totalorder %s22_s16, %s22_s16 }
   0x5   :  { %p837_p0 = scmp.ne.s32.totalorder %s22_s16, %s836_s17  ;;  %p842_p2 = scmp.lt.s32.totalorder %s836_s17, %s836_s17 }
   0x7   :  { %p843_p3 = por %p842_p2, %p841_p1 }
   0x9   :  { %p844_p4 = pnand %p843_p3, %p837_p0 }
   0xb   :  { %847 = shalt.err (!%p844_p4)
}
   0xc   :  { %24 = dma.hbm_to_vmem [thread:$0]  %s1096_s1, 128, %s22_s16, [#allocation3]  }
   0xd   :  { %888 = dma.done.wait [#allocation3], 128  }
   0xe   :  { %889 = vsyncadd [#allocation3], 4294967168  ;;  %v944_v0 = vld [vmem:[%s1095_s0] sm:$0x7]  ;;  %v949_v1 = vld [vmem:[%s1095_s0 + $0x4] sm:$0x7] }
   0xf   :  { %v32_v2 = vmul.f32 %v944_v0, %v944_v0  ;;  %s895_s24 = smov 126   ;;  %s896_s25 = smov 127   ;;  %v33_v3 = vmul.f32 %v949_v1, %v949_v1  ;;  %v909_v43 = vmov 0.0   ;;  %vm910_vm0 = vmmov 0  }
  0x10   :  { %s897_s1 = smov 125   ;;  %s898_s0 = smov 124   ;;  %769 = vmatprep.subr.mxu0 %v909_v43  ;;  %776 = vmatprep.subr.mxu1 %v909_v43  ;;  %vm154_vm1 = vcmask 1040384   ;;  %vm157_vm2 = vcmask 1043456   ;;  %vm165_vm3 = vcmask 1046528   ;;  %vm148_vm4 = vcmask 1042432  }
  0x11   :  { %44 = vrot.lane.b32.xlu1 %v32_v2, %s895_s24  ;;  %36 = vrot.lane.b32.xlu0 %v32_v2, %s896_s25  ;;  %s899_s26 = smov 123   ;;  %s900_s27 = smov 122   ;;  %vm151_vm5 = vcmask 1045504   ;;  %vm161_vm6 = vcmask 121856   ;;  %vm514_vm7 = vcmask 195584   ;;  %vm506_vm8 = vcmask 1041408  }
  0x12   :  { %s901_s28 = smov 121   ;;  %s902_s29 = smov 2   ;;  %773 = vmatprep.mubr.msk.f32.mxu0 %vm910_vm0, %v909_v43  ;;  %780 = vmatprep.mubr.msk.f32.mxu1 %vm910_vm0, %v909_v43  ;;  %vm509_vm9 = vcmask 1044480   ;;  %vm671_vm10 = vcmask 203776   ;;  %vm312_vm11 = vcmask 228352   ;;  %vm333_vm12 = vcmask 1041409  }
  0x13   :  { %s903_s30 = smov 3   ;;  %s904_s5 = smov 4   ;;  %vm701_vm13 = vcmask 130112   ;;  %vm714_vm14 = vcmask 123904   ;;  %vm336_vm15 = vcmask 58368  }
  0x14   :  { %s905_s6 = smov 1   ;;  %s906_s7 = smov 5  }
  0x15   :  { %46 = vrot.lane.b32.xlu1 %v33_v3, %s895_s24  ;;  %38 = vrot.lane.b32.xlu0 %v33_v3, %s896_s25  ;;  %s907_s8 = smov 6   ;;  %s908_s9 = smov 7  }
  0x16   :  { %s912_s15 = smov [#allocation5]  }
  0x17   :  { %s722_s16 = sshll.u32 %s912_s15, 4  ;;  %s723_s16 = int_to_ptr.vmem [resolvable:$true] %s722_s16 }
  0x19   :  { %54 = vrot.lane.b32.xlu1 %v33_v3, %s897_s1  ;;  %52 = vrot.lane.b32.xlu0 %v32_v2, %s897_s1 }
  0x1d   :  { %62 = vrot.lane.b32.xlu1 %v33_v3, %s898_s0  ;;  %60 = vrot.lane.b32.xlu0 %v32_v2, %s898_s0 }
  0x21   :  { %340 = vrot.lane.b32.xlu1 %v33_v3, %s899_s26  ;;  %338 = vrot.lane.b32.xlu0 %v32_v2, %s899_s26 }
  0x25   :  { %348 = vrot.lane.b32.xlu1 %v33_v3, %s900_s27  ;;  %346 = vrot.lane.b32.xlu0 %v32_v2, %s900_s27 }
  0x29   :  { %356 = vrot.lane.b32.xlu1 %v33_v3, %s901_s28  ;;  %354 = vrot.lane.b32.xlu0 %v32_v2, %s901_s28 }
  0x83   :  { %v45_v4 = vpop.permute.xlu1 %44  ;;  %v37_v5 = vpop.permute.xlu0 %36 }
  0x84   :  { %v42_v8 = vadd.f32 %v37_v5, %v32_v2 }
  0x86   :  { %v50_v13 = vadd.f32 %v45_v4, %v42_v8 }
  0x87   :  { %v47_v6 = vpop.permute.xlu1 %46  ;;  %v39_v7 = vpop.permute.xlu0 %38 }
  0x88   :  { %v43_v9 = vadd.f32 %v39_v7, %v33_v3 }
  0x8a   :  { %v51_v10 = vadd.f32 %v47_v6, %v43_v9 }
  0x8b   :  { %v55_v11 = vpop.permute.xlu1 %54  ;;  %v53_v12 = vpop.permute.xlu0 %52 }
  0x8c   :  { %v59_v14 = vadd.f32 %v55_v11, %v51_v10  ;;  %v58_v15 = vadd.f32 %v53_v12, %v50_v13 }
  0x8f   :  { %v63_v16 = vpop.permute.xlu1 %62  ;;  %v61_v17 = vpop.permute.xlu0 %60 }
  0x90   :  { %v67_v18 = vadd.f32 %v63_v16, %v59_v14  ;;  %v66_v19 = vadd.f32 %v61_v17, %v58_v15 }
  0x92   :  { %v69_v20 = vmax.f32 %v67_v18, 1e-16  ;;  %v68_v21 = vmax.f32 %v66_v19, 1e-16 }
  0x93   :  { %v341_v22 = vpop.permute.xlu1 %340  ;;  %v339_v23 = vpop.permute.xlu0 %338 }
  0x94   :  { %820 = vrsqrt.f32 %v69_v20  ;;  %v345_v26 = vadd.f32 %v341_v22, %v67_v18  ;;  %v344_v27 = vadd.f32 %v339_v23, %v66_v19 }
  0x95   :  { %822 = vrsqrt.f32 %v68_v21 }
  0x97   :  { %v349_v24 = vpop.permute.xlu1 %348  ;;  %v347_v25 = vpop.permute.xlu0 %346 }
  0x98   :  { %v353_v28 = vadd.f32 %v349_v24, %v345_v26  ;;  %v352_v29 = vadd.f32 %v347_v25, %v344_v27 }
  0x9b   :  { %v357_v30 = vpop.permute.xlu1 %356  ;;  %v355_v31 = vpop.permute.xlu0 %354 }
  0x9c   :  { %v361_v32 = vadd.f32 %v357_v30, %v353_v28  ;;  %v360_v33 = vadd.f32 %v355_v31, %v352_v29 }
  0x9e   :  { %v363_v34 = vmax.f32 %v361_v32, 1e-16  ;;  %v362_v36 = vmax.f32 %v360_v33, 1e-16 }
  0xa0   :  { %824 = vrsqrt.f32 %v363_v34 }
  0xa1   :  { %v969_v35 = vpop.eup %820  ;;  %826 = vrsqrt.f32 %v362_v36 }
  0xa2   :  { %v971_v37 = vpop.eup %822  ;;  %86 = vrot.lane.b32.xlu1 %v969_v35, %s902_s29 }
  0xa3   :  { %84 = vrot.lane.b32.xlu0 %v971_v37, %s902_s29 }
  0xa6   :  { %94 = vrot.lane.b32.xlu1 %v969_v35, %s903_s30 }
  0xa7   :  { %92 = vrot.lane.b32.xlu0 %v971_v37, %s903_s30 }
  0xaa   :  { %102 = vrot.lane.b32.xlu1 %v969_v35, %s904_s5 }
  0xab   :  { %100 = vrot.lane.b32.xlu0 %v971_v37, %s904_s5 }
  0xad   :  { %v981_v38 = vpop.eup %824 }
  0xae   :  { %78 = vrot.lane.b32.xlu1 %v969_v35, %s905_s6  ;;  %v983_v39 = vpop.eup %826 }
  0xaf   :  { %76 = vrot.lane.b32.xlu0 %v971_v37, %s905_s6 }
  0xb2   :  { %404 = vrot.lane.b32.xlu1 %v981_v38, %s906_s7 }
  0xb3   :  { %402 = vrot.lane.b32.xlu0 %v983_v39, %s906_s7 }
  0xb6   :  { %412 = vrot.lane.b32.xlu1 %v981_v38, %s907_s8 }
  0xb7   :  { %410 = vrot.lane.b32.xlu0 %v983_v39, %s907_s8 }
  0xba   :  { %380 = vrot.lane.b32.xlu1 %v981_v38, %s902_s29 }
  0xbb   :  { %378 = vrot.lane.b32.xlu0 %v983_v39, %s902_s29 }
  0xbe   :  { %388 = vrot.lane.b32.xlu1 %v981_v38, %s903_s30 }
  0xbf   :  { %386 = vrot.lane.b32.xlu0 %v983_v39, %s903_s30 }
  0xc2   :  { %420 = vrot.lane.b32.xlu1 %v981_v38, %s908_s9 }
  0xc3   :  { %418 = vrot.lane.b32.xlu0 %v983_v39, %s908_s9 }
  0xc6   :  { %396 = vrot.lane.b32.xlu1 %v981_v38, %s904_s5 }
  0xc7   :  { %394 = vrot.lane.b32.xlu0 %v983_v39, %s904_s5 }
  0xca   :  { %372 = vrot.lane.b32.xlu1 %v981_v38, %s905_s6 }
  0xcb   :  { %370 = vrot.lane.b32.xlu0 %v983_v39, %s905_s6 }
 0x114   :  { %v87_v40 = vpop.permute.xlu1 %86 }
 0x115   :  { %v91_v41 = vmul.f32 %v87_v40, %v949_v1  ;;  %v85_v42 = vpop.permute.xlu0 %84 }
 0x116   :  { %v90_v44 = vmul.f32 %v85_v42, %v944_v0 }
 0x117   :  { %v121_v45 = vrot.slane %v91_v41, 2 }
 0x118   :  { %v120_v46 = vrot.slane %v90_v44, 2  ;;  %v95_v47 = vpop.permute.xlu1 %94 }
 0x119   :  { %v99_v48 = vmul.f32 %v95_v47, %v949_v1  ;;  %v93_v49 = vpop.permute.xlu0 %92  ;;  %124 = vrot.lane.b32.xlu1 %v121_v45, %s895_s24 }
 0x11a   :  { %v98_v50 = vmul.f32 %v93_v49, %v944_v0  ;;  %122 = vrot.lane.b32.xlu0 %v120_v46, %s895_s24 }
 0x11b   :  { %v131_v51 = vrot.slane %v99_v48, 7 }
 0x11c   :  { %v130_v52 = vrot.slane %v98_v50, 7  ;;  %v103_v53 = vpop.permute.xlu1 %102 }
 0x11d   :  { %v107_v54 = vmul.f32 %v103_v53, %v949_v1  ;;  %v101_v55 = vpop.permute.xlu0 %100  ;;  %134 = vrot.lane.b32.xlu1 %v131_v51, %s897_s1 }
 0x11e   :  { %v106_v56 = vmul.f32 %v101_v55, %v944_v0  ;;  %132 = vrot.lane.b32.xlu0 %v130_v52, %s897_s1 }
 0x11f   :  { %v141_v57 = vrot.slane %v107_v54, 4 }
 0x120   :  { %v140_v58 = vrot.slane %v106_v56, 4  ;;  %v79_v59 = vpop.permute.xlu1 %78 }
 0x121   :  { %v83_v60 = vmul.f32 %v79_v59, %v949_v1  ;;  %v77_v61 = vpop.permute.xlu0 %76  ;;  %144 = vrot.lane.b32.xlu1 %v141_v57, %s898_s0 }
 0x122   :  { %v82_v62 = vmul.f32 %v77_v61, %v944_v0  ;;  %142 = vrot.lane.b32.xlu0 %v140_v58, %s898_s0 }
 0x123   :  { %v111_v63 = vrot.slane %v83_v60, 5  ;;  %v73_v60 = vmul.f32 %v969_v35, %v949_v1  ;;  %v512_v35 = vld [vmem:[%s1097_s2] sm:$0xff] }
 0x124   :  { %v110_v2 = vrot.slane %v82_v62, 5  ;;  %v405_v3 = vpop.permute.xlu1 %404  ;;  %v72_v62 = vmul.f32 %v971_v37, %v944_v0 }
 0x125   :  { %v409_v4 = vmul.f32 %v405_v3, %v949_v1  ;;  %v403_v5 = vpop.permute.xlu0 %402  ;;  %114 = vrot.lane.b32.xlu1 %v111_v63, %s896_s25  ;;  %v160_v3 = vld [vmem:[#allocation2] sm:$0xff] }
 0x126   :  { %v408_v6 = vmul.f32 %v403_v5, %v944_v0  ;;  %112 = vrot.lane.b32.xlu0 %v110_v2, %s896_s25 }
 0x127   :  { %v469_v7 = vrot.slane %v409_v4, 1 }
 0x128   :  { %v468_v8 = vrot.slane %v408_v6, 1  ;;  %v413_v9 = vpop.permute.xlu1 %412 }
 0x129   :  { %v417_v10 = vmul.f32 %v413_v9, %v949_v1  ;;  %v411_v11 = vpop.permute.xlu0 %410  ;;  %472 = vrot.lane.b32.xlu1 %v469_v7, %s899_s26 }
 0x12a   :  { %v416_v12 = vmul.f32 %v411_v11, %v944_v0  ;;  %470 = vrot.lane.b32.xlu0 %v468_v8, %s899_s26 }
 0x12b   :  { %v479_v13 = vrot.slane %v417_v10, 6 }
 0x12c   :  { %v478_v14 = vrot.slane %v416_v12, 6  ;;  %v381_v15 = vpop.permute.xlu1 %380 }
 0x12d   :  { %v385_v16 = vmul.f32 %v381_v15, %v949_v1  ;;  %v379_v17 = vpop.permute.xlu0 %378  ;;  %482 = vrot.lane.b32.xlu1 %v479_v13, %s900_s27 }
 0x12e   :  { %v384_v18 = vmul.f32 %v379_v17, %v944_v0  ;;  %480 = vrot.lane.b32.xlu0 %v478_v14, %s900_s27 }
 0x12f   :  { %v439_v19 = vrot.slane %v385_v16, 2 }
 0x130   :  { %v438_v20 = vrot.slane %v384_v18, 2  ;;  %v389_v21 = vpop.permute.xlu1 %388 }
 0x131   :  { %v393_v22 = vmul.f32 %v389_v21, %v949_v1  ;;  %v387_v23 = vpop.permute.xlu0 %386  ;;  %442 = vrot.lane.b32.xlu1 %v439_v19, %s895_s24 }
 0x132   :  { %v392_v24 = vmul.f32 %v387_v23, %v944_v0  ;;  %440 = vrot.lane.b32.xlu0 %v438_v20, %s895_s24 }
 0x133   :  { %v449_v25 = vrot.slane %v393_v22, 7 }
 0x134   :  { %v448_v26 = vrot.slane %v392_v24, 7  ;;  %v421_v27 = vpop.permute.xlu1 %420 }
 0x135   :  { %v425_v28 = vmul.f32 %v421_v27, %v949_v1  ;;  %v419_v29 = vpop.permute.xlu0 %418  ;;  %452 = vrot.lane.b32.xlu1 %v449_v25, %s897_s1  ;;  %v367_v27 = vmul.f32 %v981_v38, %v949_v1 }
 0x136   :  { %v424_v30 = vmul.f32 %v419_v29, %v944_v0  ;;  %450 = vrot.lane.b32.xlu0 %v448_v26, %s897_s1  ;;  %v366_v29 = vmul.f32 %v983_v39, %v944_v0 }
 0x137   :  { %v489_v31 = vrot.slane %v425_v28, 3 }
 0x138   :  { %v488_v32 = vrot.slane %v424_v30, 3  ;;  %v397_v33 = vpop.permute.xlu1 %396 }
 0x139   :  { %v401_v34 = vmul.f32 %v397_v33, %v949_v1  ;;  %v395_v36 = vpop.permute.xlu0 %394  ;;  %492 = vrot.lane.b32.xlu1 %v489_v31, %s901_s28 }
 0x13a   :  { %v400_v40 = vmul.f32 %v395_v36, %v944_v0  ;;  %490 = vrot.lane.b32.xlu0 %v488_v32, %s901_s28 }
 0x13b   :  { %v459_v41 = vrot.slane %v401_v34, 4  ;;  %v513_v34 = vld [vmem:[%s1097_s2 + $0x8] sm:$0xff]  ;;  %s911_s2 = smov [#allocation6]  }
 0x13c   :  { %v458_v42 = vrot.slane %v400_v40, 4  ;;  %v373_v44 = vpop.permute.xlu1 %372  ;;  %s732_s14 = sshll.u32 %s911_s2, 4  ;;  %s733_s14 = int_to_ptr.vmem [resolvable:$true] %s732_s14 }
 0x13d   :  { %v377_v45 = vmul.f32 %v373_v44, %v949_v1  ;;  %v371_v46 = vpop.permute.xlu0 %370  ;;  %462 = vrot.lane.b32.xlu1 %v459_v41, %s898_s0  ;;  %s848_s17 = scalar_lea.vmem %s733_s14, 32  ;;  %p853_p6 = scmp.lt.s32.totalorder %s733_s14, %s733_s14 }
 0x13e   :  { %v376_v47 = vmul.f32 %v371_v46, %v944_v0  ;;  %460 = vrot.lane.b32.xlu0 %v458_v42, %s898_s0  ;;  %p849_p5 = scmp.ne.s32.totalorder %s733_s14, %s848_s17  ;;  %p854_p7 = scmp.lt.s32.totalorder %s848_s17, %s848_s17 }
 0x13f   :  { %v429_v48 = vrot.slane %v377_v45, 5 }
 0x140   :  { %v428_v49 = vrot.slane %v376_v47, 5  ;;  %p855_p8 = por %p854_p7, %p853_p6 }
 0x141   :  { %432 = vrot.lane.b32.xlu1 %v429_v48, %s896_s25 }
 0x142   :  { %430 = vrot.lane.b32.xlu0 %v428_v49, %s896_s25  ;;  %p856_p9 = pnand %p855_p8, %p849_p5 }
 0x18b   :  { %v125_v50 = vpop.permute.xlu1 %124 }
 0x18c   :  { %v123_v51 = vpop.permute.xlu0 %122 }
 0x18f   :  { %v135_v52 = vpop.permute.xlu1 %134 }
 0x190   :  { %v133_v53 = vpop.permute.xlu0 %132  ;;  %v156_v54 = vsel %vm154_vm1, %v125_v50, %v135_v52 }
 0x191   :  { %v155_v56 = vsel %vm154_vm1, %v123_v51, %v133_v53 }
 0x193   :  { %v145_v55 = vpop.permute.xlu1 %144 }
 0x194   :  { %v143_v57 = vpop.permute.xlu0 %142  ;;  %v159_v58 = vsel %vm157_vm2, %v156_v54, %v145_v55 }
 0x195   :  { %v158_v59 = vsel %vm157_vm2, %v155_v56, %v143_v57  ;;  %777 = vmatpush3.msk.msra.mxu1 %vm165_vm3, %v159_v58 }
 0x196   :  { %770 = vmatpush3.msk.msra.mxu0 %vm165_vm3, %v158_v59  ;;  %778 = vmatprep.subr.mxu1 %v909_v43 }
 0x197   :  { %v115_v61 = vpop.permute.xlu1 %114  ;;  %771 = vmatprep.subr.mxu0 %v909_v43 }
 0x198   :  { %v150_v63 = vsel %vm148_vm4, %v73_v60, %v115_v61  ;;  %v113_v2 = vpop.permute.xlu0 %112 }
 0x199   :  { %v149_v4 = vsel %vm148_vm4, %v72_v62, %v113_v2  ;;  %v153_v5 = vsel %vm151_vm5, %v150_v63, %v125_v50 }
 0x19a   :  { %v152_v6 = vsel %vm151_vm5, %v149_v4, %v123_v51  ;;  %779 = vmatpush3.msra.mxu1 %v153_v5  ;;  %v323_v51 = vlaneseq }
 0x19b   :  { %772 = vmatpush3.msra.mxu0 %v152_v6  ;;  %v473_v37 = vpop.permute.xlu1 %472  ;;  %781 = vmatmul.mubr.msk.f32.vlgmr.msra.gmra.mxu1 %vm161_vm6, %v160_v3 }
 0x19c   :  { %v471_v43 = vpop.permute.xlu0 %470  ;;  %774 = vmatmul.mubr.msk.f32.vlgmr.msra.gmra.mxu0 %vm161_vm6, %v160_v3  ;;  %798 = vmatprep.mubr.msk.f32.mxu1 %vm514_vm7, %v512_v35  ;;  %v324_v52 = vand.u32 127, %v323_v51  ;;  %v326_v55 = vshrl.u32 %v323_v51, 7 }
 0x19d   :  { %789 = vmatprep.mubr.msk.f32.mxu0 %vm514_vm7, %v512_v35 }
 0x19e   :  { %v696_v56 = vadd.s32 4294967288, %v324_v52  ;;  %v327_v58 = vsub.s32 %v324_v52, %v326_v55 }
 0x19f   :  { %v483_v7 = vpop.permute.xlu1 %482 }
 0x1a0   :  { %v481_v8 = vpop.permute.xlu0 %480  ;;  %v508_v13 = vsel %vm506_vm8, %v473_v37, %v483_v7  ;;  %v699_v60 = vsub.s32 %v696_v56, %v326_v55 }
 0x1a1   :  { %v507_v15 = vsel %vm506_vm8, %v471_v43, %v481_v8 }
 0x1a3   :  { %v443_v9 = vpop.permute.xlu1 %442 }
 0x1a4   :  { %v441_v10 = vpop.permute.xlu0 %440 }
 0x1a7   :  { %v453_v11 = vpop.permute.xlu1 %452 }
 0x1a8   :  { %v451_v12 = vpop.permute.xlu0 %450  ;;  %v501_v19 = vsel %vm154_vm1, %v443_v9, %v453_v11 }
 0x1a9   :  { %v500_v21 = vsel %vm154_vm1, %v441_v10, %v451_v12 }
 0x1ab   :  { %v493_v14 = vpop.permute.xlu1 %492 }
 0x1ac   :  { %v491_v16 = vpop.permute.xlu0 %490  ;;  %v511_v17 = vsel %vm509_vm9, %v508_v13, %v493_v14 }
 0x1ad   :  { %v510_v18 = vsel %vm509_vm9, %v507_v15, %v491_v16  ;;  %792 = vmatprep.subr.mxu1 %v511_v17 }
 0x1ae   :  { %783 = vmatprep.subr.mxu0 %v510_v18  ;;  %793 = vmatpush3.msra.mxu1 %v511_v17 }
 0x1af   :  { %784 = vmatpush3.msra.mxu0 %v510_v18  ;;  %v463_v20 = vpop.permute.xlu1 %462 }
 0x1b0   :  { %v503_v22 = vsel %vm157_vm2, %v501_v19, %v463_v20  ;;  %v461_v23 = vpop.permute.xlu0 %460 }
 0x1b1   :  { %v502_v24 = vsel %vm157_vm2, %v500_v21, %v461_v23  ;;  %v505_v25 = vsel %vm165_vm3, %v503_v22, %v473_v37 }
 0x1b2   :  { %v504_v26 = vsel %vm165_vm3, %v502_v24, %v471_v43  ;;  %794 = vmatprep.subr.mxu1 %v505_v25 }
 0x1b3   :  { %785 = vmatprep.subr.mxu0 %v504_v26  ;;  %v433_v28 = vpop.permute.xlu1 %432  ;;  %795 = vmatpush3.msra.mxu1 %v505_v25 }
 0x1b4   :  { %v497_v30 = vsel %vm148_vm4, %v367_v27, %v433_v28  ;;  %786 = vmatpush3.msra.mxu0 %v504_v26  ;;  %v431_v31 = vpop.permute.xlu0 %430 }
 0x1b5   :  { %v496_v32 = vsel %vm148_vm4, %v366_v29, %v431_v31  ;;  %v499_v33 = vsel %vm151_vm5, %v497_v30, %v443_v9 }
 0x1b6   :  { %v498_v1 = vsel %vm151_vm5, %v496_v32, %v441_v10  ;;  %796 = vmatprep.subr.mxu1 %v499_v33 }
 0x1b7   :  { %787 = vmatprep.subr.mxu0 %v498_v1  ;;  %797 = vmatpush3.msra.mxu1 %v499_v33 }
 0x1b8   :  { %788 = vmatpush3.msra.mxu0 %v498_v1  ;;  %799 = vmatmul.mubr.msk.f32.vlgmr.msra.gmra.mxu1 %vm514_vm7, %v513_v34 }
 0x1b9   :  { %790 = vmatmul.mubr.msk.f32.vlgmr.msra.gmra.mxu0 %vm514_vm7, %v513_v34 }
 0x25b   :  { %v308_v0 = vpop.f32.mrf.mxu1 }
 0x25c   :  { %v235_v38 = vpop.f32.mrf.mxu0  ;;  %v316_v50 = vsel %vm312_vm11, %v308_v0, -inf }
 0x25d   :  { %v782_v39 = vpop.f32.mrf.mxu1  ;;  %v313_v48 = vsel %vm312_vm11, %v235_v38, -inf }
 0x25e   :  { %v775_v36 = vpop.f32.mrf.mxu0 }
 0x278   :  { %v800_v40 = vpop.f32.mrf.mxu1 }
 0x279   :  { %v791_v41 = vpop.f32.mrf.mxu0  ;;  %v681_v42 = vsel %vm671_vm10, %v800_v40, -inf }
 0x27a   :  { %682 = vmax.xlane.f32.xlu0 %v681_v42  ;;  %v675_v44 = vsel %vm671_vm10, %v791_v41, -inf  ;;  %v662_v47 = vpop.f32.mrf.mxu1 }
 0x27b   :  { %676 = vmax.xlane.f32.xlu1 %v675_v44  ;;  %v587_v45 = vpop.f32.mrf.mxu0  ;;  %v678_v49 = vsel %vm671_vm10, %v662_v47, -inf }
 0x27c   :  { %v672_v46 = vsel %vm671_vm10, %v587_v45, -inf }
 0x27e   :  { %673 = vmax.xlane.f32.xlu0 %v672_v46 }
 0x27f   :  { %314 = vmax.xlane.f32.xlu1 %v313_v48 }
 0x282   :  { %679 = vmax.xlane.f32.xlu0 %v678_v49 }
 0x286   :  { %317 = vmax.xlane.f32.xlu0 %v316_v50 }
 0x303   :  { %v683_v53 = vpop.xlane.xlu0 %682 }
 0x304   :  { %v677_v54 = vpop.xlane.xlu1 %676  ;;  %v687_v62 = vmax.f32 %v683_v53, 0.0 }
 0x305   :  { %v685_v61 = vmax.f32 %v677_v54, 0.0 }
 0x306   :  { %v710_v35 = vrot.slane %v687_v62, %v699_v60 }
 0x307   :  { %v674_v57 = vpop.xlane.xlu0 %673  ;;  %v700_v5 = vrot.slane %v685_v61, %v699_v60 }
 0x308   :  { %v684_v59 = vmax.f32 %v674_v57, 0.0  ;;  %v315_v63 = vpop.xlane.xlu1 %314 }
 0x309   :  { %v319_v6 = vmax.f32 %v315_v63, 0.0 }
 0x30a   :  { %v695_v3 = vrot.slane %v684_v59, %v327_v58 }
 0x30b   :  { %v680_v2 = vpop.xlane.xlu0 %679  ;;  %v328_v11 = vrot.slane %v319_v6, %v327_v58 }
 0x30c   :  { %v686_v4 = vmax.f32 %v680_v2, 0.0  ;;  %v702_v8 = vsel %vm701_vm13, %v700_v5, %v695_v3 }
 0x30e   :  { %v706_v37 = vrot.slane %v686_v4, %v327_v58 }
 0x30f   :  { %v318_v43 = vpop.xlane.xlu0 %317 }
 0x310   :  { %v320_v7 = vmax.f32 %v318_v43, 0.0  ;;  %v711_v9 = vsel %vm701_vm13, %v710_v35, %v706_v37 }
 0x311   :  { %v712_v10 = vsel %vm333_vm12, %v711_v9, %v702_v8 }
 0x312   :  { %v332_v12 = vrot.slane %v320_v7, %v327_v58  ;;  %715 = vst.msk [vmem:[#allocation6] sm:$0x3] %vm714_vm14, %v712_v10 }
 0x313   :  { %859 = shalt.err (!%p856_p9)
}
 0x314   :  { %735 = dma.vmem_to_hbm [thread:$0]  %s733_s14, 32, %s1099_s4, [#allocation7]   ;;  %v334_v13 = vsel %vm333_vm12, %v332_v12, %v328_v11 }
 0x315   :  { %337 = vst.msk [vmem:[#allocation5] sm:$0x3] %vm336_vm15, %v334_v13  ;;  %s868_s20 = scalar_lea.vmem %s723_s16, 32  ;;  %p873_p11 = scmp.lt.s32.totalorder %s723_s16, %s723_s16 }
 0x316   :  { %p869_p10 = scmp.ne.s32.totalorder %s723_s16, %s868_s20  ;;  %p874_p12 = scmp.lt.s32.totalorder %s868_s20, %s868_s20 }
 0x318   :  { %p875_p13 = por %p874_p12, %p873_p11 }
 0x31a   :  { %p876_p0 = pnand %p875_p13, %p869_p10 }
 0x31c   :  { %879 = shalt.err (!%p876_p0)
}
 0x31d   :  { %725 = dma.vmem_to_hbm [thread:$0]  %s723_s16, 32, %s1098_s3, [#allocation4]  }
 0x31e   :  { %890 = dma.done.wait [#allocation4], 32  }
 0x31f   :  { %891 = vsyncadd [#allocation4], 4294967264 }
 0x320   :  { %892 = dma.done.wait [#allocation7], 32  }
 0x321   :  { %893 = vsyncadd [#allocation7], 4294967264 }
 0x322   :  { %742 = vsyncpa [#allocation3], 1 }
 0x323   :  { %743 = vsyncpa [#allocation4], 1 }
 0x324   :  { %744 = vsyncpa [#allocation7], 1 }

</bundles_post_ra>
